<compile_context>
chip_gen: v5e
topology: v5e:2x2
jax: 0.10.0
libtpu: 0.0.40
codegen_flags: <defaults>
</compile_context>

<pallas_src>
import functools

import jax
import jax.numpy as jnp
from jax.experimental import pallas as pl
from jax.experimental.pallas import tpu as pltpu


def _embed_gather_kernel(ids_ref, table_ref, out_ref, *, vocab):
    # ids_ref  : (T, 1)  int32   token ids for this tile
    # table_ref: (V, D)  float32 VMEM-resident concat(pretrained, learnable)
    # out_ref  : (T, D)  float32 gathered embedding rows
    ids = ids_ref[...]                                              # (T, 1)
    t = ids.shape[0]
    col = jax.lax.broadcasted_iota(jnp.int32, (t, vocab), 1)        # (T, V)
    onehot = (col == ids).astype(table_ref.dtype)                   # (T, V)
    # One-hot gather on the MXU; HIGHEST precision keeps f32 rows exact
    # (LHS is exactly 0/1 so only the bf16x3 split of the table matters).
    out_ref[...] = jnp.dot(
        onehot,
        table_ref[...],
        preferred_element_type=jnp.float32,
        precision=jax.lax.Precision.HIGHEST,
    ).astype(out_ref.dtype)


def embedding_custom_forward(ids, pt_weight, lrn_weight, *, tokens_per_tile=512):
    """Pallas equivalent of EmbeddingCustom.forward (eval mode).

    ids        : (B, L) int32
    pt_weight  : (V, Dp) float32  (pretrained, frozen in torch)
    lrn_weight : (V, Dl) float32  (learnable nn.Embedding)
    returns    : (B, L, Dp + Dl) float32
    """
    B, L = ids.shape
    v_pt, dp = pt_weight.shape
    v_lr, dl = lrn_weight.shape
    assert v_pt == v_lr, "vocab mismatch"
    assert pt_weight.dtype == lrn_weight.dtype, "embedding dtype mismatch"
    vocab = v_pt
    d = dp + dl

    # Pre-concatenate once so the kernel does a single row gather per token.
    table = jnp.concatenate([pt_weight, lrn_weight], axis=1)        # (V, D)

    n = B * L
    flat_ids = ids.reshape(n).astype(jnp.int32)
    # Guard against out-of-range / padding ids (torch would raise; we clamp
    # rather than issue an out-of-bounds gather).
    flat_ids = jnp.clip(flat_ids, 0, vocab - 1)

    # Token tile: sublane-dense (multiple of 8), capped at tokens_per_tile.
    t = min(tokens_per_tile, max(8, ((n + 7) // 8) * 8))
    t = ((t + 7) // 8) * 8
    n_pad = ((n + t - 1) // t) * t
    if n_pad != n:
        flat_ids = jnp.concatenate(
            [flat_ids, jnp.zeros((n_pad - n,), dtype=jnp.int32)]
        )
    ids2d = flat_ids.reshape(n_pad, 1)

    kernel = functools.partial(_embed_gather_kernel, vocab=vocab)

    out_flat = pl.pallas_call(
        kernel,
        out_shape=jax.ShapeDtypeStruct((n_pad, d), table.dtype),
        grid_spec=pltpu.PrefetchScalarGridSpec(
            num_scalar_prefetch=0,
            grid=(n_pad // t,),
            in_specs=[
                # ids tile for this step (VMEM)
                pl.BlockSpec((t, 1), lambda i: (i, 0)),
                # full embedding table, resident across all steps
                pl.BlockSpec((vocab, d), lambda i: (0, 0)),
            ],
            out_specs=pl.BlockSpec((t, d), lambda i: (i, 0)),
        ),
        compiler_params=pltpu.CompilerParams(
            # Token tiles are independent -> shard across v7x's 2 TensorCores.
            dimension_semantics=("parallel",),
        ),
    )(ids2d, table)

    return out_flat[:n].reshape(B, L, d)


if __name__ == "__main__":
    # Shapes implied by the module: token ids (batch, seq); embedding tables
    # (vocab_size, pretrained_length) and (vocab_size, learnable_length).
    VOCAB = 50
    DP = 32          # pretrained_length
    DL = 16          # learnable_length
    B, L = 2, 8

    key = jax.random.PRNGKey(0)
    k_pt, k_lrn, k_ids = jax.random.split(key, 3)

    pt_weight = jax.random.normal(k_pt, (VOCAB, DP), dtype=jnp.float32)
    lrn_weight = jax.random.normal(k_lrn, (VOCAB, DL), dtype=jnp.float32)
    ids = jax.random.randint(k_ids, (B, L), 0, VOCAB, dtype=jnp.int32)

    out = embedding_custom_forward(ids, pt_weight, lrn_weight)
    out = jax.block_until_ready(out)

    # Pure-JAX reference: embed + concat(dim=2); dropout is identity in eval.
    ref = jnp.concatenate([pt_weight[ids], lrn_weight[ids]], axis=2)

    assert out.shape == (B, L, DP + DL), out.shape
    assert out.dtype == jnp.float32
    # HIGHEST-precision one-hot matmul is exact to <= ~1 ulp of f32.
    assert jnp.allclose(out, ref, atol=1e-5, rtol=1e-5), "mismatch vs reference"

    print("KERNEL_OK")
</pallas_src>

<mosaic_0001>
module attributes {stable_mosaic.version = 11 : i64} {
  func.func @_embed_gather_kernel(%arg0: i32, %arg1: memref<16x1xi32, #tpu.memory_space<vmem>>, %arg2: memref<50x48xf32, #tpu.memory_space<vmem>>, %arg3: memref<16x48xf32, #tpu.memory_space<vmem>>) attributes {dimension_semantics = [#tpu.dimension_semantics<parallel>], iteration_bounds = array<i64: 1>, scalar_prefetch = 0 : i64, scratch_operands = 0 : i64, tpu.core_type = #tpu.core_type<tc>, window_params = [{transform_indices = @transform_0, window_bounds = array<i64: 16, 1>}, {pipeline_mode = #tpu.pipeline_mode<synchronous>, transform_indices = @transform_1, window_bounds = array<i64: 50, 48>}, {transform_indices = @transform_2, window_bounds = array<i64: 16, 48>}]} {
    %c0 = arith.constant 0 : index
    %c0_0 = arith.constant 0 : index
    %0 = vector.load %arg1[%c0, %c0_0] : memref<16x1xi32, #tpu.memory_space<vmem>>, vector<16x1xi32>
    %1 = tpu.iota {dimensions = array<i32: 1>} : vector<16x50xi32>
    %2 = vector.broadcast %0 : vector<16x1xi32> to vector<16x50xi32>
    %3 = arith.cmpi eq, %1, %2 : vector<16x50xi32>
    %4 = arith.extui %3 : vector<16x50xi1> to vector<16x50xi32>
    %5 = arith.sitofp %4 : vector<16x50xi32> to vector<16x50xf32>
    %c0_1 = arith.constant 0 : index
    %c0_2 = arith.constant 0 : index
    %6 = vector.load %arg2[%c0_1, %c0_2] : memref<50x48xf32, #tpu.memory_space<vmem>>, vector<50x48xf32>
    %cst = arith.constant dense<0.000000e+00> : vector<16x48xf32>
    %7 = tpu.matmul %5, %6, %cst {dimension_numbers = #tpu.dot_dimension_numbers<[1], [0], [0], [1], [0, 0, 1, 1], [], []>, precision = #tpu.contract_precision<fp32>} : vector<16x50xf32>, vector<50x48xf32>, vector<16x48xf32> -> vector<16x48xf32>
    %c0_3 = arith.constant 0 : index
    %c0_4 = arith.constant 0 : index
    %8 = vector.load %arg3[%c0_3, %c0_4] : memref<16x48xf32, #tpu.memory_space<vmem>>, vector<16x48xf32>
    tpu.vector_store %arg3[%c0_3, %c0_4], %7 {strides = array<i32>} : memref<16x48xf32, #tpu.memory_space<vmem>>, vector<16x48xf32>,
    return
  }
  func.func @transform_0(%arg0: i32) -> (i32, i32) {
    %c0_i32 = arith.constant 0 : i32
    %c0_i32_0 = arith.constant 0 : i32
    return %arg0, %c0_i32 : i32, i32
  }
  func.func @transform_1(%arg0: i32) -> (i32, i32) {
    %c0_i32 = arith.constant 0 : i32
    %c0_i32_0 = arith.constant 0 : i32
    %c0_i32_1 = arith.constant 0 : i32
    return %c0_i32, %c0_i32_0 : i32, i32
  }
  func.func @transform_2(%arg0: i32) -> (i32, i32) {
    %c0_i32 = arith.constant 0 : i32
    %c0_i32_0 = arith.constant 0 : i32
    return %arg0, %c0_i32 : i32, i32
  }
}

</mosaic_0001>

<bundles_post_ra>
// kernel: tpu_custom_call.1
= control target key start
LH: loop header
LB: loop body
LE: loop exit
PB: predicated region body
PF: predicated region fallthrough
CT: control target
= control target key end

     0   :  { %vm42_vm0 = vcmask 1041408   ;;  %v376_v2 = vmov 0   ;;  %s476_s0 = inlined_call_operand.vmem [shape: s32[16,1], index: 0, kind: input, shape index: {}]   ;;  %s477_s1 = inlined_call_operand.vmem [shape: f32[50,48], index: 1, kind: input, shape index: {}]   ;;  %s478_s2 = inlined_call_operand.hbm [shape: f32[16,48], index: 2, kind: output, shape index: {}]  }
   0x1   :  { %v12_v0 = vld [vmem:[%s476_s0] sm:$0xff]  ;;  %v34_v1 = vld [vmem:[%s477_s1 + $0x30] sm:$0x3]  ;;  %349 = vset.pattern.permute.xlu0 %v376_v2  ;;  %v33_v4 = vld [vmem:[%s477_s1 + $0x28] sm:$0xff] }
   0x2   :  { %v44_v3 = vsel %vm42_vm0, %v34_v1, 0  ;;  %v32_v5 = vld [vmem:[%s477_s1 + $0x20] sm:$0xff]  ;;  %v31_v6 = vld [vmem:[%s477_s1 + $0x18] sm:$0xff]  ;;  %17 = vperm.xlu0 %349, %v12_v0   ;;  %v413_v8 = vand.u32 4294901760, %v33_v4  ;;  %v30_v11 = vld [vmem:[%s477_s1 + $0x10] sm:$0xff] }
   0x3   :  { %v411_v7 = vand.u32 4294901760, %v44_v3  ;;  %v415_v9 = vand.u32 4294901760, %v32_v5  ;;  %v417_v10 = vand.u32 4294901760, %v31_v6  ;;  %v29_v12 = vld [vmem:[%s477_s1 + $0x8] sm:$0xff]  ;;  %v425_v13 = vand.u32 4294901760, %v30_v11 }
   0x4   :  { %v427_v14 = vand.u32 4294901760, %v29_v12 }
   0x5   :  { %7 = vsyncpa [#allocation3], 0  ;;  %v96_v15 = vsub.f32 %v44_v3, %v411_v7  ;;  %v102_v16 = vsub.f32 %v33_v4, %v413_v8  ;;  %v108_v17 = vsub.f32 %v32_v5, %v415_v9  ;;  %197 = vmatpush.msra.mxu3 %v411_v7  ;;  %v114_v18 = vsub.f32 %v31_v6, %v417_v10  ;;  %v13_v25 = vld [vmem:[%s476_s0 + $0x8] sm:$0xff]  ;;  %v28_v40 = vld [vmem:[%s477_s1] sm:$0xff]  ;;  %s378_s1 = smov [#allocation2]   ;;  %s310_s29 = sshll.u32 %s478_s2, 4  ;;  %s311_s29 = int_to_ptr.hbm [resolvable:$true] %s310_s29 }
   0x6   :  { %v120_v19 = vsub.f32 %v30_v11, %v425_v13  ;;  %56 = vmatpush.msra.mxu0 %v411_v7  ;;  %v126_v20 = vsub.f32 %v29_v12, %v427_v14  ;;  %v67_v41 = vand.u32 4294901760, %v28_v40  ;;  %v14_v46 = vlaneseq  ;;  %s308_s26 = sshll.u32 %s378_s1, 4  ;;  %s379_s30 = smov 128   ;;  %s309_s26 = int_to_ptr.vmem [resolvable:$true] %s308_s26 }
   0x7   :  { %v97_v21 = vand.u32 4294901760, %v96_v15  ;;  %v103_v22 = vand.u32 4294901760, %v102_v16  ;;  %157 = vmatpush.msra.mxu2 %v96_v15  ;;  %v109_v23 = vand.u32 4294901760, %v108_v17  ;;  %v115_v24 = vand.u32 4294901760, %v114_v18  ;;  %199 = vmatpush.msra.mxu3 %v413_v8  ;;  %s380_s3 = smov 8  }
   0x8   :  { %58 = vmatpush.msra.mxu0 %v413_v8  ;;  %v121_v29 = vand.u32 4294901760, %v120_v19  ;;  %v127_v33 = vand.u32 4294901760, %v126_v20  ;;  %v132_v42 = vsub.f32 %v28_v40, %v67_v41  ;;  %v15_v47 = vand.u32 127, %v14_v46 }
   0x9   :  { %v98_v26 = vsub.f32 %v96_v15, %v97_v21  ;;  %v104_v27 = vsub.f32 %v102_v16, %v103_v22  ;;  %v110_v28 = vsub.f32 %v108_v17, %v109_v23  ;;  %160 = vmatpush.msra.mxu2 %v102_v16  ;;  %201 = vmatpush.msra.mxu3 %v415_v9  ;;  %vm35_vm1 = vcmask 408576  }
   0xa   :  { %60 = vmatpush.msra.mxu0 %v415_v9  ;;  %20 = vperm.xlu0 %349, %v13_v25   ;;  %v116_v32 = vsub.f32 %v114_v18, %v115_v24  ;;  %v122_v35 = vsub.f32 %v120_v19, %v121_v29  ;;  %v128_v37 = vsub.f32 %v126_v20, %v127_v33  ;;  %v133_v43 = vand.u32 4294901760, %v132_v42 }
   0xb   :  { %v99_v30 = vand.u32 4294901760, %v98_v26  ;;  %v105_v31 = vand.u32 4294901760, %v104_v27  ;;  %163 = vmatpush.msra.mxu2 %v108_v17  ;;  %203 = vmatpush.msra.mxu3 %v417_v10  ;;  %v111_v34 = vand.u32 4294901760, %v110_v28  ;;  %v377_v49 = vmov 0.0  }
   0xc   :  { %62 = vmatpush.msra.mxu0 %v417_v10  ;;  %v117_v36 = vand.u32 4294901760, %v116_v32  ;;  %v123_v38 = vand.u32 4294901760, %v122_v35  ;;  %v129_v39 = vand.u32 4294901760, %v128_v37  ;;  %v134_v44 = vsub.f32 %v132_v42, %v133_v43 }
   0xd   :  { %100 = vmatpush.msra.mxu1 %v99_v30  ;;  %166 = vmatpush.msra.mxu2 %v114_v18  ;;  %vm301_vm4 = vcmask 392192  }
   0xe   :  { %205 = vmatpush.msra.mxu3 %v425_v13  ;;  %64 = vmatpush.msra.mxu0 %v425_v13  ;;  %v135_v45 = vand.u32 4294901760, %v134_v44 }
   0xf   :  { %106 = vmatpush.msra.mxu1 %v105_v31  ;;  %169 = vmatpush.msra.mxu2 %v120_v19 }
  0x10   :  { %207 = vmatpush.msra.mxu3 %v427_v14  ;;  %66 = vmatpush.msra.mxu0 %v427_v14 }
  0x11   :  { %112 = vmatpush.msra.mxu1 %v111_v34  ;;  %172 = vmatpush.msra.mxu2 %v126_v20 }
  0x12   :  { %209 = vmatpush.msra.mxu3 %v67_v41  ;;  %68 = vmatpush.msra.mxu0 %v67_v41 }
  0x13   :  { %118 = vmatpush.msra.mxu1 %v117_v36  ;;  %175 = vmatpush.msra.mxu2 %v132_v42 }
  0x14   :  { %337 = vmatpush.msrb.mxu3 %v411_v7  ;;  %235 = vmatpush.msrb.mxu0 %v97_v21 }
  0x15   :  { %124 = vmatpush.msra.mxu1 %v123_v38  ;;  %330 = vmatpush.msrb.mxu2 %v97_v21 }
  0x16   :  { %338 = vmatpush.msrb.mxu3 %v413_v8  ;;  %239 = vmatpush.msrb.mxu0 %v103_v22 }
  0x17   :  { %130 = vmatpush.msra.mxu1 %v129_v39  ;;  %331 = vmatpush.msrb.mxu2 %v103_v22 }
  0x18   :  { %339 = vmatpush.msrb.mxu3 %v415_v9  ;;  %243 = vmatpush.msrb.mxu0 %v109_v23 }
  0x19   :  { %332 = vmatpush.msrb.mxu2 %v109_v23  ;;  %136 = vmatpush.msra.mxu1 %v135_v45 }
  0x1a   :  { %340 = vmatpush.msrb.mxu3 %v417_v10  ;;  %247 = vmatpush.msrb.mxu0 %v115_v24 }
  0x1b   :  { %279 = vmatpush.msrb.mxu1 %v411_v7  ;;  %333 = vmatpush.msrb.mxu2 %v115_v24 }
  0x1c   :  { %341 = vmatpush.msrb.mxu3 %v425_v13  ;;  %251 = vmatpush.msrb.mxu0 %v121_v29 }
  0x1d   :  { %281 = vmatpush.msrb.mxu1 %v413_v8  ;;  %334 = vmatpush.msrb.mxu2 %v121_v29 }
  0x1e   :  { %342 = vmatpush.msrb.mxu3 %v427_v14  ;;  %255 = vmatpush.msrb.mxu0 %v127_v33 }
  0x1f   :  { %283 = vmatpush.msrb.mxu1 %v415_v9  ;;  %335 = vmatpush.msrb.mxu2 %v127_v33 }
  0x20   :  { %343 = vmatpush.msrb.mxu3 %v67_v41  ;;  %259 = vmatpush.msrb.mxu0 %v133_v43 }
  0x21   :  { %285 = vmatpush.msrb.mxu1 %v417_v10  ;;  %336 = vmatpush.msrb.mxu2 %v133_v43 }
  0x23   :  { %287 = vmatpush.msrb.mxu1 %v425_v13 }
  0x25   :  { %289 = vmatpush.msrb.mxu1 %v427_v14 }
  0x27   :  { %291 = vmatpush.msrb.mxu1 %v67_v41 }
  0x74   :  { %v18_v48 = vpop.permute.xlu0 %17 }
  0x75   :  { %vm22_vm2 = vcmp.eq.s32.totalorder %v15_v47, %v18_v48 }
  0x76   :  { %v322_v50 = vsel %vm22_vm2, 1.0, %v377_v49 }
  0x77   :  { %324 = vmatmul.msk.f32.vlgmr.msra.gmra.mxu1 %vm35_vm1, %v322_v50  ;;  %v37_v51 = vsel %vm35_vm1, %v322_v50, 0 }
  0x78   :  { %v70_v52 = vsub.f32 %v37_v51, %v37_v51 }
  0x7a   :  { %178 = vmatmul.f32.vlgmr.msra.gmra.mxu2 %v70_v52  ;;  %v71_v53 = vand.u32 4294901760, %v70_v52 }
  0x7c   :  { %213 = vmatmul.f32.vlgmr.msra.gmra.mxu3 %v71_v53  ;;  %v21_v54 = vpop.permute.xlu0 %20  ;;  %v72_v55 = vsub.f32 %v70_v52, %v71_v53 }
  0x7d   :  { %vm23_vm3 = vcmp.eq.s32.totalorder %v15_v47, %v21_v54 }
  0x7e   :  { %v323_v56 = vsel %vm23_vm3, 1.0, %v377_v49  ;;  %v73_v57 = vand.u32 4294901760, %v72_v55 }
  0x7f   :  { %325 = vmatmul.msk.f32.gmra.mxu1 %vm35_vm1, %v323_v56  ;;  %v40_v58 = vsel %vm35_vm1, %v323_v56, 0 }
  0x80   :  { %74 = vmatmul.f32.vlgmr.msra.gmra.mxu0 %v73_v57  ;;  %v78_v59 = vsub.f32 %v40_v58, %v40_v58 }
  0x82   :  { %183 = vmatmul.f32.gmra.mxu2 %v78_v59  ;;  %v79_v60 = vand.u32 4294901760, %v78_v59 }
  0x84   :  { %219 = vmatmul.f32.gmra.mxu3 %v79_v60  ;;  %v80_v61 = vsub.f32 %v78_v59, %v79_v60 }
  0x86   :  { %v81_v62 = vand.u32 4294901760, %v80_v61 }
  0x87   :  { %328 = vmatmul.msk.f32.vlgmr.msrb.gmra.mxu1 %vm35_vm1, %v322_v50 }
  0x88   :  { %82 = vmatmul.f32.gmra.mxu0 %v81_v62 }
  0x8a   :  { %327 = vmatmul.msk.f32.vlgmr.msrb.gmra.mxu2 %vm35_vm1, %v323_v56 }
  0x8c   :  { %329 = vmatmul.msk.f32.vlgmr.msrb.gmra.mxu3 %vm35_vm1, %v323_v56 }
  0x90   :  { %326 = vmatmul.msk.f32.vlgmr.msrb.gmra.mxu0 %vm35_vm1, %v322_v50 }
  0xf4   :  { %v139_v63 = vpop.f32.mrf.mxu1 }
  0xfc   :  { %v143_v3 = vpop.f32.mrf.mxu1 }
  0xfd   :  { %v75_v0 = vpop.f32.mrf.mxu0  ;;  %v179_v1 = vpop.f32.mrf.mxu2 }
  0xfe   :  { %v140_v4 = vadd.f32 %v139_v63, %v75_v0 }
  0xff   :  { %v214_v2 = vpop.f32.mrf.mxu3 }
 0x100   :  { %v180_v9 = vadd.f32 %v179_v1, %v140_v4 }
 0x102   :  { %v215_v11 = vadd.f32 %v214_v2, %v180_v9 }
 0x104   :  { %v294_v17 = vpop.f32.mrf.mxu1 }
 0x105   :  { %v83_v5 = vpop.f32.mrf.mxu0  ;;  %v184_v6 = vpop.f32.mrf.mxu2 }
 0x106   :  { %v144_v7 = vadd.f32 %v143_v3, %v83_v5 }
 0x107   :  { %v220_v8 = vpop.f32.mrf.mxu3 }
 0x108   :  { %v185_v10 = vadd.f32 %v184_v6, %v144_v7 }
 0x10a   :  { %v221_v12 = vadd.f32 %v220_v8, %v185_v10 }
 0x10d   :  { %v262_v13 = vpop.f32.mrf.mxu0  ;;  %v266_v14 = vpop.f32.mrf.mxu2 }
 0x10e   :  { %v263_v15 = vadd.f32 %v262_v13, %v215_v11  ;;  %v267_v16 = vadd.f32 %v266_v14, %v221_v12 }
 0x10f   :  { %v298_v18 = vpop.f32.mrf.mxu3 }
 0x110   :  { %v295_v19 = vadd.f32 %v294_v17, %v263_v15  ;;  %v299_v20 = vadd.f32 %v298_v18, %v267_v16 }
 0x112   :  { %302 = vst.msk [vmem:[#allocation2] sm:$0xff] %vm301_vm4, %v295_v19 }
 0x113   :  { %303 = vst.msk [vmem:[#allocation2 + $0x8] sm:$0xff] %vm301_vm4, %v299_v20 }
 0x114   :  { %316 = dma.vmem_to_hbm [thread:$0]  %s309_s26, 256, %s311_s29, [#allocation3], %s379_s30, %s379_s30, %s380_s3  }
 0x115   :  { %374 = dma.done.wait [#allocation3], 256  }
 0x116   :  { %375 = vsyncadd [#allocation3], 4294967040 }
 0x117   :  { %321 = vsyncpa [#allocation3], 1 }

</bundles_post_ra>
